<compile_context>
chip_gen: v5e
topology: v5e:2x2
jax: 0.10.0
libtpu: 0.0.40
codegen_flags: <defaults>
</compile_context>

<pallas_src>
import functools

import jax
import jax.numpy as jnp
from jax.experimental import pallas as pl
from jax.experimental.pallas import tpu as pltpu

N_CLS = 4          # stand-in for settings.N_CLASSES
FEAT_C = 128       # forced by pred.repeat_interleave(128, dim=1)
DESC_C = 64        # des_head feat_out_dim (256 in the original, small here)
GRID_S = 8         # SuperPoint cell size

_VMEM = pl.BlockSpec(memory_space=pltpu.MemorySpace.VMEM)
_SMEM = pl.BlockSpec(memory_space=pltpu.MemorySpace.SMEM)


# -----------------------------------------------------------------------------
# Kernel helpers (traced inside kernels only)
# -----------------------------------------------------------------------------
def _argmax_rows(att2d):
    """argmax over the leading (class) axis of a (n_cls, hw) tile -> (1, hw)."""
    n = att2d.shape[0]
    best_val = att2d[0:1, :]
    best_idx = jnp.zeros_like(best_val)
    for c in range(1, n):                       # n_cls is small & static
        cur = att2d[c:c + 1, :]
        upd = cur > best_val                    # strict '>' keeps lowest index on ties
        best_val = jnp.where(upd, cur, best_val)
        best_idx = jnp.where(upd, jnp.full_like(best_idx, float(c)), best_idx)
    return best_idx


def _fused_body(pred, scal_ref, feat_ref, wdet_ref, wdesc_ref, bdesc_ref,
                heat_ref, desc_ref):
    """Shared body: folded detector conv + descriptor head on one feat tile."""
    feat = feat_ref[...]                                            # (C, tc) bf16
    # detector fold: w_det.feat + sum(w_det)*pred + b   (MXU in bf16, f32 acc)
    heat = jnp.dot(wdet_ref[...], feat, preferred_element_type=jnp.float32)
    heat_ref[...] = heat + scal_ref[0, 0] * pred + scal_ref[0, 1]
    # descriptor head 1x1 conv on the SAME resident feat tile
    desc = jnp.dot(wdesc_ref[...], feat,
                   preferred_element_type=jnp.float32) + bdesc_ref[...]
    desc_ref[...] = desc.astype(desc_ref.dtype)


# -----------------------------------------------------------------------------
# Pallas kernels
# -----------------------------------------------------------------------------
def fused_from_att_kernel(scal_ref, att_ref, feat_ref, wdet_ref, wdesc_ref,
                          bdesc_ref, heat_ref, desc_ref):
    """argmax(att) -> pred, then folded detector + descriptor head (one feat read)."""
    pred = _argmax_rows(att_ref[...])                               # (1, tc) f32
    _fused_body(pred, scal_ref, feat_ref, wdet_ref, wdesc_ref, bdesc_ref,
                heat_ref, desc_ref)


def fused_from_pred_kernel(scal_ref, pred_ref, feat_ref, wdet_ref, wdesc_ref,
                           bdesc_ref, heat_ref, desc_ref):
    """Same, but with a precomputed (resized) pred map."""
    _fused_body(pred_ref[...], scal_ref, feat_ref, wdet_ref, wdesc_ref,
                bdesc_ref, heat_ref, desc_ref)


def pred_resize_kernel(att_ref, py_ref, pxt_ref, out_ref):
    """General path: argmax over classes then bilinear resize (as matmuls).
    Only used when att_class and feat_map have different spatial shapes."""
    att = att_ref[...]                                   # (Ncls, hc, wc)
    n_cls = att.shape[0]
    best_val = att[0]
    best_idx = jnp.zeros_like(best_val)
    for c in range(1, n_cls):
        upd = att[c] > best_val
        best_val = jnp.where(upd, att[c], best_val)
        best_idx = jnp.where(upd, jnp.full_like(best_idx, float(c)), best_idx)
    t = jnp.dot(py_ref[...], best_idx, preferred_element_type=jnp.float32)
    out_ref[...] = jnp.dot(t, pxt_ref[...], preferred_element_type=jnp.float32)


def upsample_cols_kernel(heat_ref, uxt_ref, out_ref):
    """Hoisted column stage of the x8 bilinear upsample: hx = H @ Ux^T."""
    out_ref[...] = jnp.dot(heat_ref[...], uxt_ref[...],
                           preferred_element_type=jnp.float32)


def upsample_rows_sigmoid_kernel(hx_ref, uy_ref, out_ref):
    """Row stage + sigmoid: out_tile = sigmoid(Uy_tile @ hx); lane-dense wf."""
    out_ref[...] = jax.nn.sigmoid(
        jnp.dot(uy_ref[...], hx_ref[...], preferred_element_type=jnp.float32))


def sample_desc_kernel(kp_ref, d_ref, out_ref, *, s, hc, wc, d_ch):
    """Faithful sample_descriptors: grid_sample(bilinear, zeros padding,
    align_corners=True) in separable (wc,K)/(hc,K) form + L2 normalize.
    kp_ref: (2, Kp) padded keypoints (x; y).  d_ref: (D*hc, wc) bf16."""
    kp = kp_ref[...]
    kp_cols = kp.shape[1]
    x = kp[0:1, :]                                       # (1, Kp) full-res x
    y = kp[1:2, :]                                       # (1, Kp) full-res y
    # keypoint normalization exactly as in sample_descriptors()
    gx = ((x - s / 2.0 + 0.5) / (wc * s - s / 2.0 - 0.5)) * 2.0 - 1.0
    gy = ((y - s / 2.0 + 0.5) / (hc * s - s / 2.0 - 0.5)) * 2.0 - 1.0
    # grid_sample align_corners=True mapping to pixel coordinates
    ix = (gx + 1.0) * 0.5 * (wc - 1)
    iy = (gy + 1.0) * 0.5 * (hc - 1)
    x0 = jnp.floor(ix)
    y0 = jnp.floor(iy)
    wx1 = ix - x0
    wx0 = 1.0 - wx1
    wy1 = iy - y0
    wy0 = 1.0 - wy1
    x0i = x0.astype(jnp.int32)
    y0i = y0.astype(jnp.int32)
    x1i = x0i + 1
    y1i = y0i + 1

    col_iota = jax.lax.broadcasted_iota(jnp.int32, (wc, kp_cols), 0)   # (wc, Kp)
    row_iota = jax.lax.broadcasted_iota(jnp.int32, (hc, kp_cols), 0)   # (hc, Kp)

    def onehot(idx, wgt, iota, size):
        ok = (idx >= 0) & (idx < size)
        w = jnp.where(ok, wgt, 0.0)                      # zeros-padding for OOB corners
        return w * (iota == idx).astype(jnp.float32)

    # separable weighted one-hots: (hc+wc)*Kp compares instead of 4*hc*wc*Kp
    wxm = onehot(x0i, wx0, col_iota, wc) + onehot(x1i, wx1, col_iota, wc)  # (wc, Kp)
    wym = onehot(y0i, wy0, row_iota, hc) + onehot(y1i, wy1, row_iota, hc)  # (hc, Kp)

    # stage 1: gather x-direction via one MXU matmul (bf16 in, f32 acc)
    tmp = jnp.dot(d_ref[...], wxm.astype(d_ref.dtype),
                  preferred_element_type=jnp.float32)                     # (D*hc, Kp)
    # stage 2: weighted sum over hc (y-direction)
    tmp = tmp.reshape(d_ch, hc, kp_cols)
    sampled = jnp.sum(tmp * wym[None, :, :], axis=1)                      # (D, Kp)

    sq = jnp.sum(sampled * sampled, axis=0, keepdims=True)
    inv = jax.lax.rsqrt(jnp.maximum(sq, 1e-24))          # == 1/max(||.||, 1e-12)
    out_ref[...] = sampled * inv


# -----------------------------------------------------------------------------
# Tiling helpers
# -----------------------------------------------------------------------------
def _num_tensorcores():
    """2 TensorCores on v7x, 1 on v5e/v6e.
    TODO(synk): switch to pltpu.get_tpu_info() once core count is exposed there."""
    try:
        kind = jax.devices()[0].device_kind.lower()
    except Exception:
        return 1
    return 2 if "v7" in kind else 1


def _pick_col_tile(hw):
    """Lane-axis tile for the fused feat-map kernel: multiple of 128 when
    possible (lane-dense, pipelined multi-step grid); full hw for tiny maps."""
    if hw <= 512:
        return hw
    for t in (1024, 512, 256, 128):
        if hw % t == 0:
            return t
    return 512            # cdiv grid; Pallas handles the partial edge block


def _pick_row_tile(hf, n_cores):
    """Single grid step on 1-TC chips (serial loop = pure overhead); on v7x
    split into >= n_cores row tiles (multiple of 8 dividing hf)."""
    if n_cores <= 1 or hf < 16:
        return hf
    for d in range(hf // n_cores, 7, -1):
        if hf % d == 0 and d % 8 == 0:
            return d
    return hf


# -----------------------------------------------------------------------------
# Pallas wrappers
# -----------------------------------------------------------------------------
def fused_det_desc(pred_or_att, feat_bf, w_det_bf, w_desc_bf, b_desc, scal, *,
                   from_att):
    """One gridded pallas_call producing heat_coarse (1, hw) and desc (D, hw)."""
    hw = feat_bf.shape[1]
    d = w_desc_bf.shape[0]
    lead = pred_or_att.shape[0]
    tc = _pick_col_tile(hw)
    kernel = fused_from_att_kernel if from_att else fused_from_pred_kernel
    return pl.pallas_call(
        kernel,
        out_shape=(jax.ShapeDtypeStruct((1, hw), jnp.float32),
                   jax.ShapeDtypeStruct((d, hw), jnp.bfloat16)),
        grid=(pl.cdiv(hw, tc),),
        in_specs=[
            _SMEM,                                                  # [sum(w_det), b_det]
            pl.BlockSpec((lead, tc), lambda i: (0, i)),             # att or pred
            pl.BlockSpec((FEAT_C, tc), lambda i: (0, i)),           # feat (bf16)
            pl.BlockSpec((1, FEAT_C), lambda i: (0, 0)),            # w_det (bf16)
            pl.BlockSpec((d, FEAT_C), lambda i: (0, 0)),            # w_desc (bf16)
            pl.BlockSpec((d, 1), lambda i: (0, 0)),                 # b_desc (f32)
        ],
        out_specs=(pl.BlockSpec((1, tc), lambda i: (0, i)),
                   pl.BlockSpec((d, tc), lambda i: (0, i))),
        compiler_params=pltpu.CompilerParams(dimension_semantics=("parallel",)),
    )(scal, pred_or_att, feat_bf, w_det_bf, w_desc_bf, b_desc)


def pred_resize(att, py, pxt):
    h1, w1 = py.shape[0], pxt.shape[1]
    return pl.pallas_call(
        pred_resize_kernel,
        out_shape=jax.ShapeDtypeStruct((h1, w1), jnp.float32),
        in_specs=[_VMEM, _VMEM, _VMEM],
        out_specs=_VMEM,
    )(att, py, pxt)


def upsample_cols(heat_c, uxt):
    h1, _ = heat_c.shape
    wf = uxt.shape[1]
    return pl.pallas_call(
        upsample_cols_kernel,
        out_shape=jax.ShapeDtypeStruct((h1, wf), jnp.float32),
        in_specs=[_VMEM, _VMEM],
        out_specs=_VMEM,
    )(heat_c, uxt)


def upsample_rows_sigmoid(hx, uy):
    h1, wf = hx.shape
    hf = uy.shape[0]
    th = _pick_row_tile(hf, _num_tensorcores())
    assert hf % th == 0, "row tile must divide upsampled height"
    return pl.pallas_call(
        upsample_rows_sigmoid_kernel,
        out_shape=jax.ShapeDtypeStruct((hf, wf), jnp.float32),
        grid=(hf // th,),
        in_specs=[pl.BlockSpec((h1, wf), lambda i: (0, 0)),
                  pl.BlockSpec((th, h1), lambda i: (i, 0))],
        out_specs=pl.BlockSpec((th, wf), lambda i: (i, 0)),
        compiler_params=pltpu.CompilerParams(dimension_semantics=("parallel",)),
    )(hx, uy)


def sample_descriptors_pallas(keypoints, desc_dhw, hc, wc, d_ch, s=GRID_S):
    """desc_dhw: (D*hc, wc) bf16 descriptor map.  keypoints: (K, 2) f32 (x, y)."""
    k = keypoints.shape[0]
    kp_pad = pl.cdiv(max(k, 1), 128) * 128               # lane-dense K
    kp = jnp.zeros((kp_pad, 2), jnp.float32).at[:k].set(keypoints.astype(jnp.float32))
    kp_t = kp.T                                           # (2, Kp): Kp on lane axis
    kernel = functools.partial(sample_desc_kernel, s=float(s), hc=hc, wc=wc,
                               d_ch=d_ch)
    out = pl.pallas_call(
        kernel,
        out_shape=jax.ShapeDtypeStruct((d_ch, kp_pad), jnp.float32),
        in_specs=[_VMEM, _VMEM],
        out_specs=_VMEM,
    )(kp_t, desc_dhw)
    return out[:, :k]


# -----------------------------------------------------------------------------
# Plain JAX glue
# -----------------------------------------------------------------------------
def bilinear_resize_matrix(s_out, s_in, align_corners):
    """(s_out, s_in) matrix M such that y = M @ x performs 1-D bilinear resize."""
    out_idx = jnp.arange(s_out, dtype=jnp.float32)
    if s_out == 1:
        src = jnp.zeros((1,), jnp.float32)
    elif align_corners:
        src = out_idx * (s_in - 1) / (s_out - 1)
    else:
        src = jnp.maximum((out_idx + 0.5) * (s_in / s_out) - 0.5, 0.0)
    i0 = jnp.clip(jnp.floor(src), 0, s_in - 1).astype(jnp.int32)
    i1 = jnp.minimum(i0 + 1, s_in - 1)
    frac = src - i0.astype(jnp.float32)
    rows = jnp.arange(s_out)
    m = jnp.zeros((s_out, s_in), jnp.float32)
    m = m.at[rows, i0].add(1.0 - frac)
    m = m.at[rows, i1].add(frac)
    return m


def backbone_standin(x, params):
    # TODO(synk): VGGBackbone_att definition not provided; deterministic patch
    # projection producing feat_map (N,128,H/8,W/8) and att_class (N,Ncls,H/8,W/8).
    n, c, h, w = x.shape
    hc, wc = h // GRID_S, w // GRID_S
    patches = x.reshape(n, c, hc, GRID_S, wc, GRID_S)
    patches = patches.transpose(0, 2, 4, 1, 3, 5).reshape(n, hc * wc, c * GRID_S * GRID_S)
    feat = jnp.tanh(patches @ params["w_bb"].T + params["b_bb"])          # (N, hw, 128)
    feat_map = feat.transpose(0, 2, 1).reshape(n, FEAT_C, hc, wc)
    att = patches @ params["w_att"].T + params["b_att"]                   # (N, hw, Ncls)
    att_class = att.transpose(0, 2, 1).reshape(n, N_CLS, hc, wc)
    return feat_map, att_class


def extract_keypoints(heat, nms_radius, threshold, k):
    # TODO(synk): DetectorHead internals not provided; simple-NMS + exact
    # hierarchical top-k (per-row top-k, then a merge over row winners) stand-in.
    h, w = heat.shape
    window = 2 * nms_radius + 1
    local_max = jax.lax.reduce_window(heat, -jnp.inf, jax.lax.max,
                                      (window, window), (1, 1), "SAME")
    nms = jnp.where((heat == local_max) & (heat >= threshold), heat, 0.0)
    kk = min(k, w)                                        # exact: a row holds <= w winners
    row_vals, row_cols = jax.lax.top_k(nms, kk)           # (h, kk)
    scores, flat_idx = jax.lax.top_k(row_vals.reshape(-1), k)
    rows = flat_idx // kk
    cols = row_cols.reshape(-1)[flat_idx]
    keypoints = jnp.stack([cols.astype(jnp.float32), rows.astype(jnp.float32)],
                          axis=-1)                         # (K, 2) as (x, y)
    return keypoints, scores


def ramm_point_forward(params, x, vi_or_ir=1, curr_max_kp=64, curr_key_thresh=0.005):
    del vi_or_ir  # both branches of the original forward are identical
    feat_map, att_class = backbone_standin(x, params)     # NCHW
    n = x.shape[0]
    assert n == 1, "original module's pred.expand(...) path assumes batch 1"
    hc_a, wc_a = att_class.shape[2], att_class.shape[3]
    h1, w1 = feat_map.shape[2], feat_map.shape[3]          # corresponds to (60, 80)
    hf, wf = h1 * GRID_S, w1 * GRID_S                      # corresponds to (480, 640)
    hw1 = h1 * w1
    d_ch = params["w_desc"].shape[0]

    # bf16 into the MXU (halved HBM/VMEM bytes), f32 accumulation in-kernel
    feat_bf = feat_map[0].reshape(FEAT_C, hw1).astype(jnp.bfloat16)
    w_det_bf = params["w_det"].astype(jnp.bfloat16)
    w_desc_bf = params["w_desc"].astype(jnp.bfloat16)
    # scalar fold terms kept in f32: [sum(w_det), b_det] in SMEM
    scal = jnp.concatenate([jnp.sum(params["w_det"]).reshape(1, 1),
                            params["b_det"].reshape(1, 1)], axis=1)       # (1, 2)

    # --- fused RAMM gauge fold + detector 1x1 + descriptor head (one feat read)
    if (hc_a, wc_a) == (h1, w1):
        att_flat = att_class[0].reshape(N_CLS, hw1)
        heat_c_flat, desc_flat = fused_det_desc(att_flat, feat_bf, w_det_bf,
                                                w_desc_bf, params["b_desc"],
                                                scal, from_att=True)
    else:
        # general path: argmax + bilinear resize (align_corners=False), then fold
        py = bilinear_resize_matrix(h1, hc_a, align_corners=False)
        pxt = bilinear_resize_matrix(w1, wc_a, align_corners=False).T
        pred2d = pred_resize(att_class[0], py, pxt)                       # (h1, w1)
        heat_c_flat, desc_flat = fused_det_desc(pred2d.reshape(1, hw1), feat_bf,
                                                w_det_bf, w_desc_bf,
                                                params["b_desc"], scal,
                                                from_att=False)
    heat_c = heat_c_flat.reshape(h1, w1)

    # --- single-channel x8 bilinear upsample (align_corners=True) + sigmoid ---
    uy = bilinear_resize_matrix(hf, h1, align_corners=True)
    uxt = bilinear_resize_matrix(wf, w1, align_corners=True).T
    hx = upsample_cols(heat_c, uxt)                        # (h1, wf): hoisted col stage
    heat = upsample_rows_sigmoid(hx, uy)                   # (hf, wf)

    # --- keypoint extraction (glue) -------------------------------------------
    keypoints, scores = extract_keypoints(heat, 4, curr_key_thresh, curr_max_kp)

    # --- sample_descriptors (Pallas, separable gather, K padded to 128) -------
    desc_dhw = desc_flat.reshape(d_ch * h1, w1)            # (D*hc, wc), bf16, free reshape
    descriptors = sample_descriptors_pallas(keypoints, desc_dhw, hc=h1, wc=w1,
                                            d_ch=d_ch, s=GRID_S)

    return {"keypoints": [keypoints], "scores": [scores], "descriptors": [descriptors]}


# -----------------------------------------------------------------------------
if __name__ == "__main__":
    key = jax.random.PRNGKey(0)
    k1, k2, k3, k4, kx = jax.random.split(key, 5)
    params = {
        "w_bb": 0.1 * jax.random.normal(k1, (FEAT_C, GRID_S * GRID_S), jnp.float32),
        "b_bb": jnp.zeros((FEAT_C,), jnp.float32),
        "w_att": 0.1 * jax.random.normal(k2, (N_CLS, GRID_S * GRID_S), jnp.float32),
        "b_att": jnp.zeros((N_CLS,), jnp.float32),
        "w_det": 0.1 * jax.random.normal(k3, (1, FEAT_C), jnp.float32),
        "b_det": jnp.zeros((1, 1), jnp.float32),
        "w_desc": 0.1 * jax.random.normal(k4, (DESC_C, FEAT_C), jnp.float32),
        "b_desc": jnp.zeros((DESC_C, 1), jnp.float32),
    }
    # small image consistent with the N x 1 x H x W input convention
    x = jax.random.uniform(kx, (1, 1, 64, 64), jnp.float32)

    out = ramm_point_forward(params, x, vi_or_ir=1,
                             curr_max_kp=64, curr_key_thresh=0.005)

    kp = jax.block_until_ready(out["keypoints"][0])
    sc = jax.block_until_ready(out["scores"][0])
    de = jax.block_until_ready(out["descriptors"][0])
    assert kp.shape == (64, 2) and sc.shape == (64,) and de.shape == (DESC_C, 64)
    assert bool(jnp.all(jnp.isfinite(de)))
    print("KERNEL_OK")
</pallas_src>

<mosaic_0001>
module attributes {stable_mosaic.version = 11 : i64} {
  func.func @fused_from_att_kernel(%arg0: i32, %arg1: memref<1x2xf32, #tpu.memory_space<smem>>, %arg2: memref<4x64xf32, #tpu.memory_space<vmem>>, %arg3: memref<128x64xbf16, #tpu.memory_space<vmem>>, %arg4: memref<1x128xbf16, #tpu.memory_space<vmem>>, %arg5: memref<64x128xbf16, #tpu.memory_space<vmem>>, %arg6: memref<64x1xf32, #tpu.memory_space<vmem>>, %arg7: memref<1x64xf32, #tpu.memory_space<vmem>>, %arg8: memref<64x64xbf16, #tpu.memory_space<vmem>>) attributes {dimension_semantics = [#tpu.dimension_semantics<parallel>], iteration_bounds = array<i64: 1>, scalar_prefetch = 0 : i64, scratch_operands = 0 : i64, tpu.core_type = #tpu.core_type<tc>, window_params = [{transform_indices = @transform_0, window_bounds = array<i64: 1, 2>}, {transform_indices = @transform_1, window_bounds = array<i64: 4, 64>}, {transform_indices = @transform_2, window_bounds = array<i64: 128, 64>}, {pipeline_mode = #tpu.pipeline_mode<synchronous>, transform_indices = @transform_3, window_bounds = array<i64: 1, 128>}, {pipeline_mode = #tpu.pipeline_mode<synchronous>, transform_indices = @transform_4, window_bounds = array<i64: 64, 128>}, {pipeline_mode = #tpu.pipeline_mode<synchronous>, transform_indices = @transform_5, window_bounds = array<i64: 64, 1>}, {transform_indices = @transform_6, window_bounds = array<i64: 1, 64>}, {transform_indices = @transform_7, window_bounds = array<i64: 64, 64>}]} {
    %c0 = arith.constant 0 : index
    %c0_0 = arith.constant 0 : index
    %0 = vector.load %arg2[%c0, %c0_0] : memref<4x64xf32, #tpu.memory_space<vmem>>, vector<4x64xf32>
    %1 = vector.extract_strided_slice %0 {offsets = [0, 0], sizes = [1, 64], strides = [1, 1]} : vector<4x64xf32> to vector<1x64xf32>
    %cst = arith.constant 0.000000e+00 : f32
    %2 = vector.broadcast %cst : f32 to vector<1x64xf32>
    %3 = vector.extract_strided_slice %0 {offsets = [1, 0], sizes = [1, 64], strides = [1, 1]} : vector<4x64xf32> to vector<1x64xf32>
    %4 = arith.cmpf ogt, %3, %1 : vector<1x64xf32>
    %5 = arith.select %4, %3, %1 : vector<1x64xi1>, vector<1x64xf32>
    %cst_1 = arith.constant 1.000000e+00 : f32
    %6 = vector.broadcast %cst_1 : f32 to vector<1x64xf32>
    %7 = arith.select %4, %6, %2 : vector<1x64xi1>, vector<1x64xf32>
    %8 = vector.extract_strided_slice %0 {offsets = [2, 0], sizes = [1, 64], strides = [1, 1]} : vector<4x64xf32> to vector<1x64xf32>
    %9 = arith.cmpf ogt, %8, %5 : vector<1x64xf32>
    %10 = arith.select %9, %8, %5 : vector<1x64xi1>, vector<1x64xf32>
    %cst_2 = arith.constant 2.000000e+00 : f32
    %11 = vector.broadcast %cst_2 : f32 to vector<1x64xf32>
    %12 = arith.select %9, %11, %7 : vector<1x64xi1>, vector<1x64xf32>
    %13 = vector.extract_strided_slice %0 {offsets = [3, 0], sizes = [1, 64], strides = [1, 1]} : vector<4x64xf32> to vector<1x64xf32>
    %14 = arith.cmpf ogt, %13, %10 : vector<1x64xf32>
    %cst_3 = arith.constant 3.000000e+00 : f32
    %15 = vector.broadcast %cst_3 : f32 to vector<1x64xf32>
    %16 = arith.select %14, %15, %12 : vector<1x64xi1>, vector<1x64xf32>
    %c0_4 = arith.constant 0 : index
    %c0_5 = arith.constant 0 : index
    %17 = vector.load %arg3[%c0_4, %c0_5] : memref<128x64xbf16, #tpu.memory_space<vmem>>, vector<128x64xbf16>
    %c0_6 = arith.constant 0 : index
    %c0_7 = arith.constant 0 : index
    %18 = vector.load %arg4[%c0_6, %c0_7] : memref<1x128xbf16, #tpu.memory_space<vmem>>, vector<1x128xbf16>
    %cst_8 = arith.constant dense<0.000000e+00> : vector<1x64xf32>
    %19 = tpu.matmul %18, %17, %cst_8 {dimension_numbers = #tpu.dot_dimension_numbers<[1], [0], [0], [1], [0, 0, 1, 1], [], []>} : vector<1x128xbf16>, vector<128x64xbf16>, vector<1x64xf32> -> vector<1x64xf32>
    %c0_9 = arith.constant 0 : index
    %c0_10 = arith.constant 0 : index
    %20 = memref.load %arg1[%c0_9, %c0_10] : memref<1x2xf32, #tpu.memory_space<smem>>
    %21 = vector.broadcast %20 : f32 to vector<1x64xf32>
    %22 = arith.mulf %21, %16 : vector<1x64xf32>
    %23 = arith.addf %19, %22 : vector<1x64xf32>
    %c0_11 = arith.constant 0 : index
    %c1 = arith.constant 1 : index
    %24 = memref.load %arg1[%c0_11, %c1] : memref<1x2xf32, #tpu.memory_space<smem>>
    %25 = vector.broadcast %24 : f32 to vector<1x64xf32>
    %26 = arith.addf %23, %25 : vector<1x64xf32>
    %c0_12 = arith.constant 0 : index
    %c0_13 = arith.constant 0 : index
    %27 = vector.load %arg7[%c0_12, %c0_13] : memref<1x64xf32, #tpu.memory_space<vmem>>, vector<1x64xf32>
    tpu.vector_store %arg7[%c0_12, %c0_13], %26 {strides = array<i32>} : memref<1x64xf32, #tpu.memory_space<vmem>>, vector<1x64xf32>,
    %c0_14 = arith.constant 0 : index
    %c0_15 = arith.constant 0 : index
    %28 = vector.load %arg5[%c0_14, %c0_15] : memref<64x128xbf16, #tpu.memory_space<vmem>>, vector<64x128xbf16>
    %cst_16 = arith.constant dense<0.000000e+00> : vector<64x64xf32>
    %29 = tpu.matmul %28, %17, %cst_16 {dimension_numbers = #tpu.dot_dimension_numbers<[1], [0], [0], [1], [0, 0, 1, 1], [], []>} : vector<64x128xbf16>, vector<128x64xbf16>, vector<64x64xf32> -> vector<64x64xf32>
    %c0_17 = arith.constant 0 : index
    %c0_18 = arith.constant 0 : index
    %30 = vector.load %arg6[%c0_17, %c0_18] : memref<64x1xf32, #tpu.memory_space<vmem>>, vector<64x1xf32>
    %31 = vector.broadcast %30 : vector<64x1xf32> to vector<64x64xf32>
    %32 = arith.addf %29, %31 : vector<64x64xf32>
    %33 = arith.truncf %32 : vector<64x64xf32> to vector<64x64xbf16>
    %c0_19 = arith.constant 0 : index
    %c0_20 = arith.constant 0 : index
    %34 = vector.load %arg8[%c0_19, %c0_20] : memref<64x64xbf16, #tpu.memory_space<vmem>>, vector<64x64xbf16>
    tpu.vector_store %arg8[%c0_19, %c0_20], %33 {strides = array<i32>} : memref<64x64xbf16, #tpu.memory_space<vmem>>, vector<64x64xbf16>,
    return
  }
  func.func @transform_0(%arg0: i32) -> (i32, i32) {
    %c0_i32 = arith.constant 0 : i32
    %c0_i32_0 = arith.constant 0 : i32
    %c0_i32_1 = arith.constant 0 : i32
    return %c0_i32, %c0_i32_0 : i32, i32
  }
  func.func @transform_1(%arg0: i32) -> (i32, i32) {
    %c0_i32 = arith.constant 0 : i32
    %c0_i32_0 = arith.constant 0 : i32
    return %c0_i32, %arg0 : i32, i32
  }
  func.func @transform_2(%arg0: i32) -> (i32, i32) {
    %c0_i32 = arith.constant 0 : i32
    %c0_i32_0 = arith.constant 0 : i32
    return %c0_i32, %arg0 : i32, i32
  }
  func.func @transform_3(%arg0: i32) -> (i32, i32) {
    %c0_i32 = arith.constant 0 : i32
    %c0_i32_0 = arith.constant 0 : i32
    %c0_i32_1 = arith.constant 0 : i32
    return %c0_i32, %c0_i32_0 : i32, i32
  }
  func.func @transform_4(%arg0: i32) -> (i32, i32) {
    %c0_i32 = arith.constant 0 : i32
    %c0_i32_0 = arith.constant 0 : i32
    %c0_i32_1 = arith.constant 0 : i32
    return %c0_i32, %c0_i32_0 : i32, i32
  }
  func.func @transform_5(%arg0: i32) -> (i32, i32) {
    %c0_i32 = arith.constant 0 : i32
    %c0_i32_0 = arith.constant 0 : i32
    %c0_i32_1 = arith.constant 0 : i32
    return %c0_i32, %c0_i32_0 : i32, i32
  }
  func.func @transform_6(%arg0: i32) -> (i32, i32) {
    %c0_i32 = arith.constant 0 : i32
    %c0_i32_0 = arith.constant 0 : i32
    return %c0_i32, %arg0 : i32, i32
  }
  func.func @transform_7(%arg0: i32) -> (i32, i32) {
    %c0_i32 = arith.constant 0 : i32
    %c0_i32_0 = arith.constant 0 : i32
    return %c0_i32, %arg0 : i32, i32
  }
}

</mosaic_0001>

<bundles_post_ra>
// kernel: tpu_custom_call.1
= control target key start
LH: loop header
LB: loop body
LE: loop exit
PB: predicated region body
PF: predicated region fallthrough
CT: control target
= control target key end

     0   :  { %13 = vsyncpa [#allocation4], 0  ;;  %s597_s0 = inlined_call_operand.vmem [shape: f32[1,2], index: 0, kind: input, shape index: {}]   ;;  %s598_s1 = inlined_call_operand.vmem [shape: f32[4,64], index: 1, kind: input, shape index: {}]   ;;  %s599_s2 = inlined_call_operand.vmem [shape: bf16[128,64], index: 2, kind: input, shape index: {}]   ;;  %s600_s3 = inlined_call_operand.vmem [shape: bf16[1,128], index: 3, kind: input, shape index: {}]   ;;  %s601_s4 = inlined_call_operand.vmem [shape: bf16[64,128], index: 4, kind: input, shape index: {}]   ;;  %s602_s5 = inlined_call_operand.vmem [shape: f32[64,1], index: 5, kind: input, shape index: {}]   ;;  %s603_s6 = inlined_call_operand.hbm [shape: f32[1,64], index: 6, kind: output, shape index: {0}]   ;;  %s604_s7 = inlined_call_operand.hbm [shape: bf16[64,64], index: 7, kind: output, shape index: {1}]  }
   0x1   :  { %14 = vsyncpa [#allocation3], 0 }
   0x2   :  { %15 = vsyncpa [#allocation7], 0  ;;  %s21_s26 = sshll.u32 %s597_s0, 4  ;;  %s467_s27 = smov [#allocation2]   ;;  %s22_s26 = int_to_ptr.vmem [resolvable:$true] %s21_s26 }
   0x3   :  { %24 = dma.vmem_to_smem %s22_s26, 16, %s467_s27, [#allocation4]  }
   0x4   :  { %461 = dma.done.wait [#allocation4], 16  }
   0x5   :  { %462 = vsyncadd [#allocation4], 4294967280 }
   0x6   :  { %39 = sfence }
   0x7   :  { %v370_v0 = vld [vmem:[%s599_s2 + $0x38] sm:$0xff]  ;;  %v369_v1 = vld [vmem:[%s599_s2 + $0x30] sm:$0xff]  ;;  %v468_v3 = vmov 0   ;;  %v161_v4 = vld [vmem:[%s602_s5] sm:$0xff]  ;;  %s81_s22 = sld [smem:[#allocation2]]  ;;  %v469_v26 = vmov 0.0  }
   0x8   :  { %375 = vmatpush.bf16.msra.mxu2 %v370_v0  ;;  %376 = vmatpush.bf16.msra.mxu3 %v370_v0  ;;  %v163_v2 = vld [vmem:[%s602_s5 + $0x10] sm:$0xff]  ;;  %v368_v5 = vld [vmem:[%s599_s2 + $0x28] sm:$0xff]  ;;  %v367_v6 = vld [vmem:[%s599_s2 + $0x20] sm:$0xff]  ;;  %s286_s25 = sshll.u32 %s603_s6, 4  ;;  %vm151_vm3 = vcmask 516096   ;;  %vm270_vm4 = vcmask 519168   ;;  %s287_s25 = int_to_ptr.hbm [resolvable:$true] %s286_s25 }
   0x9   :  { %233 = vmatpush.bf16.msra.mxu1 %v370_v0  ;;  %135 = vmatpush.bf16.msra.mxu0 %v370_v0  ;;  %v366_v7 = vld [vmem:[%s599_s2 + $0x18] sm:$0xff]  ;;  %v162_v9 = vld [vmem:[%s602_s5 + $0x8] sm:$0xff]  ;;  %v365_v10 = vld [vmem:[%s599_s2 + $0x10] sm:$0xff]  ;;  %s471_s6 = smov [#allocation6]   ;;  %s296_s29 = sshll.u32 %s604_s7, 4  ;;  %s297_s29 = int_to_ptr.hbm [resolvable:$true] %s296_s29 }
   0xa   :  { %399 = vset.pattern.permute.xlu1 %v468_v3  ;;  %398 = vset.pattern.permute.xlu0 %v468_v3  ;;  %v164_v8 = vld [vmem:[%s602_s5 + $0x18] sm:$0xff]  ;;  %v165_v11 = vld [vmem:[%s602_s5 + $0x20] sm:$0xff]  ;;  %v364_v12 = vld [vmem:[%s599_s2 + $0x8] sm:$0xff]  ;;  %s294_s26 = sshll.u32 %s471_s6, 4  ;;  %s472_s30 = smov 64   ;;  %s295_s26 = int_to_ptr.vmem [resolvable:$true] %s294_s26 }
   0xb   :  { %181 = vperm.xlu1 %399, %v163_v2   ;;  %171 = vperm.xlu0 %398, %v161_v4   ;;  %v168_v13 = vld [vmem:[%s602_s5 + $0x38] sm:$0xff]  ;;  %v167_v14 = vld [vmem:[%s602_s5 + $0x30] sm:$0xff]  ;;  %v363_v15 = vld [vmem:[%s599_s2] sm:$0xff]  ;;  %s473_s8 = smov 4  }
   0xc   :  { %377 = vmatpush.bf16.msra.mxu2 %v369_v1  ;;  %378 = vmatpush.bf16.msra.mxu3 %v369_v1  ;;  %v166_v16 = vld [vmem:[%s602_s5 + $0x28] sm:$0xff]  ;;  %v373_v18 = vld [vmem:[%s601_s4 + $0x10] sm:$0xff]  ;;  %v371_v19 = vld [vmem:[%s601_s4] sm:$0xff] }
   0xd   :  { %234 = vmatpush.bf16.msra.mxu1 %v369_v1  ;;  %136 = vmatpush.bf16.msra.mxu0 %v369_v1  ;;  %v372_v17 = vld [vmem:[%s601_s4 + $0x8] sm:$0xff]  ;;  %v80_v20 = vld [vmem:[%s600_s3] sm:$0x1]  ;;  %v374_v21 = vld [vmem:[%s601_s4 + $0x18] sm:$0xff]  ;;  %v82_v33 = vstv %s81_s22  ;;  %s346_s3 = sld [smem:[#allocation2 + $0x1]] }
   0xe   :  { %400 = vset.pattern.permute.xlu2 %v468_v3  ;;  %v40_v22 = vld [vmem:[%s598_s1] sm:$0xf]  ;;  %s470_s1 = smov [#allocation5]  }
   0xf   :  { %191 = vperm.xlu2 %400, %v165_v11   ;;  %v42_v23 = vrot.slane %v40_v22, 7  ;;  %s284_s4 = sshll.u32 %s470_s1, 4  ;;  %s285_s4 = int_to_ptr.vmem [resolvable:$true] %s284_s4 }
  0x10   :  { %379 = vmatpush.bf16.msra.mxu2 %v368_v5  ;;  %380 = vmatpush.bf16.msra.mxu3 %v368_v5 }
  0x11   :  { %235 = vmatpush.bf16.msra.mxu1 %v368_v5  ;;  %137 = vmatpush.bf16.msra.mxu0 %v368_v5  ;;  %vm44_vm0 = vcmp.gt.f32.partialorder %v40_v22, %v42_v23 }
  0x12   :  { %v45_v24 = vsel %vm44_vm0, %v40_v22, %v42_v23  ;;  %v46_v27 = vsel %vm44_vm0, 1.0, %v469_v26 }
  0x13   :  { %186 = vperm.xlu1 %399, %v164_v8   ;;  %176 = vperm.xlu0 %398, %v162_v9   ;;  %v48_v25 = vrot.slane %v45_v24, 7  ;;  %v53_v28 = vrot.slane %v46_v27, 7  ;;  %v149_v40 = vstv %s346_s3 }
  0x14   :  { %381 = vmatpush.bf16.msra.mxu2 %v367_v6  ;;  %382 = vmatpush.bf16.msra.mxu3 %v367_v6 }
  0x15   :  { %236 = vmatpush.bf16.msra.mxu1 %v367_v6  ;;  %138 = vmatpush.bf16.msra.mxu0 %v367_v6  ;;  %vm50_vm1 = vcmp.gt.f32.partialorder %v40_v22, %v48_v25 }
  0x16   :  { %v51_v29 = vsel %vm50_vm1, %v40_v22, %v48_v25  ;;  %v55_v30 = vsel %vm50_vm1, 2.0, %v53_v28 }
  0x17   :  { %196 = vperm.xlu2 %400, %v166_v16   ;;  %v57_v31 = vrot.slane %v51_v29, 7  ;;  %v61_v32 = vrot.slane %v55_v30, 7 }
  0x18   :  { %383 = vmatpush.bf16.msra.mxu2 %v366_v7  ;;  %384 = vmatpush.bf16.msra.mxu3 %v366_v7 }
  0x19   :  { %237 = vmatpush.bf16.msra.mxu1 %v366_v7  ;;  %139 = vmatpush.bf16.msra.mxu0 %v366_v7  ;;  %vm59_vm2 = vcmp.gt.f32.partialorder %v40_v22, %v57_v31 }
  0x1a   :  { %v63_v34 = vsel %vm59_vm2, 3.0, %v61_v32 }
  0x1b   :  { %206 = vperm.xlu1 %399, %v168_v13   ;;  %201 = vperm.xlu0 %398, %v167_v14   ;;  %v83_v35 = vmul.f32 %v82_v33, %v63_v34 }
  0x1c   :  { %385 = vmatpush.bf16.msra.mxu2 %v365_v10  ;;  %386 = vmatpush.bf16.msra.mxu3 %v365_v10 }
  0x1d   :  { %238 = vmatpush.bf16.msra.mxu1 %v365_v10  ;;  %140 = vmatpush.bf16.msra.mxu0 %v365_v10  ;;  %v133_v37 = vrot.slane %v83_v35, 3 }
  0x20   :  { %387 = vmatpush.bf16.msra.mxu2 %v364_v12  ;;  %388 = vmatpush.bf16.msra.mxu3 %v364_v12 }
  0x21   :  { %239 = vmatpush.bf16.msra.mxu1 %v364_v12  ;;  %141 = vmatpush.bf16.msra.mxu0 %v364_v12 }
  0x24   :  { %389 = vmatpush.bf16.msra.mxu2 %v363_v15  ;;  %390 = vmatpush.bf16.msra.mxu3 %v363_v15 }
  0x25   :  { %240 = vmatpush.bf16.msra.mxu1 %v363_v15  ;;  %142 = vmatpush.bf16.msra.mxu0 %v363_v15 }
  0x27   :  { %246 = vmatmul.bf16.vlgmr.msra.gmra.mxu2 %v372_v17  ;;  %251 = vmatmul.bf16.vlgmr.msra.gmra.mxu3 %v373_v18 }
  0x28   :  { %241 = vmatmul.bf16.vlgmr.msra.gmra.mxu1 %v371_v19  ;;  %143 = vmatmul.bf16.vlgmr.msra.gmra.mxu0 %v80_v20 }
  0x37   :  { %256 = vmatmul.bf16.gmra.mxu3 %v374_v21 }
  0x69   :  { %v192_v41 = vpop.permute.xlu2 %191 }
  0x71   :  { %v197_v57 = vpop.permute.xlu2 %196 }
  0x7d   :  { %v172_v36 = vpop.permute.xlu0 %171  ;;  %v182_v44 = vpop.permute.xlu1 %181 }
  0x85   :  { %v177_v51 = vpop.permute.xlu0 %176  ;;  %v187_v59 = vpop.permute.xlu1 %186 }
  0x8d   :  { %v202_v2 = vpop.permute.xlu0 %201  ;;  %v207_v6 = vpop.permute.xlu1 %206 }
  0xa5   :  { %v242_v38 = vpop.f32.mrf.mxu1  ;;  %v144_v39 = vpop.f32.mrf.mxu0 }
  0xa6   :  { %v243_v42 = vadd.f32 %v242_v38, %v172_v36  ;;  %v145_v43 = vadd.f32 %v144_v39, %v133_v37 }
  0xa8   :  { %v262_v45 = vpack.c.bf16 %v243_v42, %v243_v42  ;;  %v150_v46 = vadd.f32 %v149_v40, %v145_v43 }
  0xaa   :  { %271 = vst.msk [vmem:[#allocation6] sm:$0xf] %vm270_vm4, %v262_v45  ;;  %v247_v47 = vpop.f32.mrf.mxu2  ;;  %v252_v48 = vpop.f32.mrf.mxu3 }
  0xab   :  { %v248_v49 = vadd.f32 %v247_v47, %v182_v44  ;;  %v253_v50 = vadd.f32 %v252_v48, %v192_v41  ;;  %152 = vst.msk [vmem:[#allocation5] sm:$0x1] %vm151_vm3, %v150_v46 }
  0xac   :  { %289 = dma.vmem_to_hbm [thread:$0]  %s285_s4, 16, %s287_s25, [#allocation3]  }
  0xad   :  { %v264_v52 = vpack.c.bf16 %v248_v49, %v248_v49  ;;  %v266_v53 = vpack.c.bf16 %v253_v50, %v253_v50  ;;  %v244_v54 = vpop.f32.mrf.mxu1  ;;  %v146_v55 = vpop.f32.mrf.mxu0 }
  0xae   :  { %v245_v56 = vadd.f32 %v244_v54, %v177_v51 }
  0xaf   :  { %273 = vst.msk [vmem:[#allocation6 + $0x8] sm:$0xf] %vm270_vm4, %v264_v52 }
  0xb0   :  { %275 = vst.msk [vmem:[#allocation6 + $0x10] sm:$0xf] %vm270_vm4, %v266_v53  ;;  %v263_v58 = vpack.c.bf16 %v245_v56, %v245_v56 }
  0xb2   :  { %272 = vst.msk [vmem:[#allocation6 + $0x4] sm:$0xf] %vm270_vm4, %v263_v58  ;;  %v249_v60 = vpop.f32.mrf.mxu2  ;;  %v254_v61 = vpop.f32.mrf.mxu3 }
  0xb3   :  { %v250_v62 = vadd.f32 %v249_v60, %v187_v59  ;;  %v255_v63 = vadd.f32 %v254_v61, %v197_v57 }
  0xb5   :  { %v265_v0 = vpack.c.bf16 %v250_v62, %v250_v62  ;;  %v267_v1 = vpack.c.bf16 %v255_v63, %v255_v63 }
  0xb7   :  { %274 = vst.msk [vmem:[#allocation6 + $0xc] sm:$0xf] %vm270_vm4, %v265_v0 }
  0xb8   :  { %276 = vst.msk [vmem:[#allocation6 + $0x14] sm:$0xf] %vm270_vm4, %v267_v1 }
  0xba   :  { %v257_v3 = vpop.f32.mrf.mxu3 }
  0xbb   :  { %v258_v4 = vadd.f32 %v257_v3, %v202_v2 }
  0xbd   :  { %v268_v5 = vpack.c.bf16 %v258_v4, %v258_v4 }
  0xbf   :  { %277 = vst.msk [vmem:[#allocation6 + $0x18] sm:$0xf] %vm270_vm4, %v268_v5 }
  0xc2   :  { %v259_v7 = vpop.f32.mrf.mxu3 }
  0xc3   :  { %v260_v8 = vadd.f32 %v259_v7, %v207_v6 }
  0xc5   :  { %v269_v9 = vpack.c.bf16 %v260_v8, %v260_v8 }
  0xc7   :  { %278 = vst.msk [vmem:[#allocation6 + $0x1c] sm:$0xf] %vm270_vm4, %v269_v9 }
  0xc8   :  { %302 = dma.vmem_to_hbm [thread:$0]  %s295_s26, 512, %s297_s29, [#allocation7], %s472_s30, %s472_s30, %s473_s8  }
  0xc9   :  { %463 = dma.done.wait [#allocation3], 16  }
  0xca   :  { %464 = vsyncadd [#allocation3], 4294967280 }
  0xcb   :  { %465 = dma.done.wait [#allocation7], 512  }
  0xcc   :  { %466 = vsyncadd [#allocation7], 4294966784 }
  0xcd   :  { %311 = vsyncpa [#allocation3], 1 }
  0xce   :  { %312 = vsyncpa [#allocation7], 1 }
  0xcf   :  { %313 = vsyncpa [#allocation4], 1 }

</bundles_post_ra>
